<compile_context>
chip_gen: v5e
topology: v5e:2x2
jax: 0.10.0
libtpu: 0.0.40
codegen_flags: <defaults>
</compile_context>

<pallas_src>
import numpy as np
import jax
import jax.numpy as jnp
from jax.experimental import pallas as pl
from jax.experimental.pallas import tpu as pltpu

LANE = 128                      # vreg lane width: pad all channel axes to this
BN_EPS = 1e-5
_ERF_CLAMP = 3.925724029541015625
_INV_SQRT2 = 0.7071067811865476


# ----------------------------------------------------------------------------
# In-kernel math helpers
# ----------------------------------------------------------------------------
def _erf_f32(x):
    """Eigen/XLA rational-polynomial erf for f32 (matches torch's exact GELU to
    f32 precision); avoids relying on an erf lowering inside Mosaic."""
    x = jnp.clip(x, -_ERF_CLAMP, _ERF_CLAMP)
    x2 = x * x
    p = jnp.float32(-2.72614225801306e-10)
    p = p * x2 + jnp.float32(2.77068142495902e-08)
    p = p * x2 + jnp.float32(-2.10102402082508e-06)
    p = p * x2 + jnp.float32(-5.69250639462346e-05)
    p = p * x2 + jnp.float32(-7.34990630326855e-04)
    p = p * x2 + jnp.float32(-2.95459980854025e-03)
    p = p * x2 + jnp.float32(-1.60960333262415e-02)
    p = p * x
    q = jnp.float32(-1.45660718464996e-05)
    q = q * x2 + jnp.float32(-2.13374055278905e-04)
    q = q * x2 + jnp.float32(-1.68282697438203e-03)
    q = q * x2 + jnp.float32(-7.37332916720468e-03)
    q = q * x2 + jnp.float32(-1.42647390514189e-02)
    return p / q


def _gelu_exact(x):
    # torch.nn.GELU() default (approximate='none'): x * Phi(x)
    return jnp.float32(0.5) * x * (jnp.float32(1.0) + _erf_f32(x * jnp.float32(_INV_SQRT2)))


def _bn_gelu(h, gamma, beta):
    # BatchNorm1d with batch statistics (biased variance) followed by exact GELU.
    mean = jnp.mean(h, axis=0, keepdims=True)
    var = jnp.mean((h - mean) ** 2, axis=0, keepdims=True)
    h = (h - mean) * jax.lax.rsqrt(var + jnp.float32(BN_EPS))
    return _gelu_exact(h * gamma + beta)


def _mm(a, b):
    # bf16 MXU matmul with f32 accumulation.
    return jnp.dot(a.astype(jnp.bfloat16), b.astype(jnp.bfloat16),
                   preferred_element_type=jnp.float32)


# ----------------------------------------------------------------------------
# Fused Pallas kernels
# ----------------------------------------------------------------------------
def _pre_block_kernel(a_ref, x_ref, w1_ref, b1_ref, g1_ref, bt1_ref,
                      w2_ref, b2_ref, p_ref, wp_ref, bp_ref, xc_ref):
    """Pre-coarsen GCN (2 layers) fused with scatter-mean pool + Linear projection.

    A_hat is loaded into VMEM once and reused by both GCNConv layers.
    """
    a = a_ref[...]                                            # (N, N) bf16
    # GCN layer 1:  A @ X @ W1 + b1  -> BatchNorm -> GELU
    h = _mm(_mm(a, x_ref[...]), w1_ref[...]) + b1_ref[...]
    h = _bn_gelu(h, g1_ref[...], bt1_ref[...])
    # GCN layer 2 (last pre-coarsen layer: no norm / act)
    h = _mm(_mm(a, h), w2_ref[...]) + b2_ref[...]
    # coarsen_graph: scatter(x, perm, reduce='mean') as pooling matmul, then Linear
    xc = _mm(_mm(p_ref[...], h), wp_ref[...]) + bp_ref[...]
    xc_ref[...] = xc.astype(xc_ref.dtype)


def _post_block_kernel(a_ref, x_ref, w1_ref, b1_ref, g1_ref, bt1_ref,
                       w2_ref, b2_ref, g2_ref, bt2_ref, w3_ref, b3_ref,
                       pb_ref, hw1_ref, hb1_ref, hw2_ref, hb2_ref,
                       hw3_ref, hb3_ref, o_ref):
    """Post-coarsen GCN (3 layers) fused with the MLPGraphHead.

    A_coarse is loaded into VMEM once and reused by all three GCNConv layers.
    """
    a = a_ref[...]                                            # (C, C) bf16
    # GCN layer 1
    h = _mm(_mm(a, x_ref[...]), w1_ref[...]) + b1_ref[...]
    h = _bn_gelu(h, g1_ref[...], bt1_ref[...])
    # GCN layer 2
    h = _mm(_mm(a, h), w2_ref[...]) + b2_ref[...]
    h = _bn_gelu(h, g2_ref[...], bt2_ref[...])
    # GCN layer 3 (last layer: no norm / act)
    h = _mm(_mm(a, h), w3_ref[...]) + b3_ref[...]
    # MLPGraphHead: global_mean_pool then Lin -> GELU -> Lin -> GELU -> Lin
    g = _mm(pb_ref[...], h)
    g = _gelu_exact(_mm(g, hw1_ref[...]) + hb1_ref[...])
    g = _gelu_exact(_mm(g, hw2_ref[...]) + hb2_ref[...])
    o_ref[...] = _mm(g, hw3_ref[...]) + hb3_ref[...]


# ----------------------------------------------------------------------------
# pallas_call wrappers (whole problem is VMEM-resident at these sizes)
# ----------------------------------------------------------------------------
_COMPILER_PARAMS = pltpu.CompilerParams(vmem_limit_bytes=32 * 1024 * 1024)


def _cost(flops, transcendentals, args, out_bytes):
    bytes_accessed = sum(int(np.prod(a.shape)) * a.dtype.itemsize for a in args)
    return pl.CostEstimate(flops=int(flops), transcendentals=int(transcendentals),
                           bytes_accessed=int(bytes_accessed + out_bytes))


def pre_block(a, x, w1, b1, g1, bt1, w2, b2, p_mean, wp, bp):
    n, f = x.shape
    c = p_mean.shape[0]
    args = (a, x, w1, b1, g1, bt1, w2, b2, p_mean, wp, bp)
    flops = 2 * (2 * n * n * f + 2 * n * f * f + c * n * f + c * f * f)
    return pl.pallas_call(
        _pre_block_kernel,
        out_shape=jax.ShapeDtypeStruct((c, f), jnp.bfloat16),
        compiler_params=_COMPILER_PARAMS,
        cost_estimate=_cost(flops, n * f, args, c * f * 2),
    )(*args)


def post_block(a_c, xc, w1, b1, g1, bt1, w2, b2, g2, bt2, w3, b3,
               pool_b, hw1, hb1, hw2, hb2, hw3, hb3):
    c, f = xc.shape
    bsz = pool_b.shape[0]
    args = (a_c, xc, w1, b1, g1, bt1, w2, b2, g2, bt2, w3, b3,
            pool_b, hw1, hb1, hw2, hb2, hw3, hb3)
    flops = 2 * (3 * c * c * f + 3 * c * f * f + bsz * c * f + 3 * bsz * f * f)
    return pl.pallas_call(
        _post_block_kernel,
        out_shape=jax.ShapeDtypeStruct((bsz, f), jnp.float32),
        compiler_params=_COMPILER_PARAMS,
        cost_estimate=_cost(flops, 2 * c * f + 2 * bsz * f, args, bsz * f * 4),
    )(*args)


# ----------------------------------------------------------------------------
# Plain-JAX / numpy glue (graph structure, clustering, pooling matrices, padding)
# ----------------------------------------------------------------------------
def normalize_adj(a):
    """gcn_norm: add remaining self loops, D^{-1/2} (A+I) D^{-1/2}."""
    diag = jnp.diagonal(a)
    a = a + jnp.diag(jnp.where(diag > 0, 0.0, 1.0).astype(jnp.float32))
    deg = jnp.sum(a, axis=1)
    dinv = jnp.where(deg > 0, jax.lax.rsqrt(deg), 0.0)
    return a * dinv[:, None] * dinv[None, :]


def build_norm_adj(edge_index, num_nodes):
    src = jnp.asarray(edge_index[0])
    dst = jnp.asarray(edge_index[1])
    a = jnp.zeros((num_nodes, num_nodes), jnp.float32).at[dst, src].add(1.0)
    return normalize_adj(a)


def deterministic_clusters(batch_np, n_clusters):
    # TODO(synk): KMeans/GMM clustering (sklearn + joblib, data-dependent and
    # non-deterministic) has no Pallas equivalent; replaced with a deterministic
    # per-graph round-robin assignment that mimics the per-graph offsets.
    clusters = np.zeros(batch_np.shape[0], dtype=np.int32)
    offset = 0
    for b in np.unique(batch_np):
        mask = batch_np == b
        k = int(min(n_clusters, mask.sum()))
        clusters[mask] = (np.arange(mask.sum()) % k) + offset
        offset += k
    return clusters


def _pad2(w, rows, cols):
    return jnp.pad(w, ((0, rows - w.shape[0]), (0, cols - w.shape[1])))


def init_params(key, in_ch, hidden, out_ch):
    ks = jax.random.split(key, 13)

    def lin_w(k, fi, fo):
        return (jax.random.normal(k, (fi, fo), jnp.float32) / jnp.sqrt(fi)).astype(jnp.float32)

    def lin_b(k, fo):
        return (0.01 * jax.random.normal(k, (1, fo), jnp.float32)).astype(jnp.float32)

    ones = jnp.ones((1, hidden), jnp.float32)
    zeros = jnp.zeros((1, hidden), jnp.float32)
    return dict(
        # pre-coarsen GCN (2 layers, norm+gelu after layer 1 only)
        pre_w1=lin_w(ks[0], in_ch, hidden), pre_b1=zeros, pre_g1=ones, pre_bt1=zeros,
        pre_w2=lin_w(ks[1], hidden, hidden), pre_b2=zeros,
        # coarsen_projection Linear
        proj_w=lin_w(ks[2], hidden, hidden), proj_b=lin_b(ks[3], hidden),
        # post-coarsen GCN (3 layers, norm+gelu after layers 1 and 2)
        post_w1=lin_w(ks[4], hidden, hidden), post_b1=zeros, post_g1=ones, post_bt1=zeros,
        post_w2=lin_w(ks[5], hidden, hidden), post_b2=zeros, post_g2=ones, post_bt2=zeros,
        post_w3=lin_w(ks[6], hidden, hidden), post_b3=zeros,
        # MLPGraphHead
        h_w1=lin_w(ks[7], hidden, hidden), h_b1=lin_b(ks[8], hidden),
        h_w2=lin_w(ks[9], hidden, hidden), h_b2=lin_b(ks[10], hidden),
        h_w3=lin_w(ks[11], hidden, out_ch),
        h_b3=(0.01 * jax.random.normal(ks[12], (1, out_ch), jnp.float32)).astype(jnp.float32),
    )


def gcn_with_coarsening_forward(params, x, edge_index, batch_np, n_clusters):
    num_nodes = x.shape[0]
    num_graphs = int(batch_np.max()) + 1
    out_ch = params["h_w3"].shape[1]
    bf16, f32 = jnp.bfloat16, jnp.float32
    F = LANE

    # ---- normalized dense adjacency of the fine graph ----
    a = build_norm_adj(edge_index, num_nodes).astype(bf16)

    # ---- clustering + coarse-graph structure ----
    cluster = deterministic_clusters(batch_np, n_clusters)      # contiguous 0..C-1
    num_clusters = int(cluster.max()) + 1
    cluster_j = jnp.asarray(cluster)

    # scatter(x, perm, reduce='mean') as a pooling-matrix matmul
    onehot = (cluster_j[None, :] == jnp.arange(num_clusters)[:, None]).astype(f32)
    p_mean = (onehot / jnp.maximum(jnp.sum(onehot, axis=1, keepdims=True), 1.0)).astype(bf16)

    # remapped edges, drop self-edges, build coarse normalized adjacency
    src_c = cluster_j[jnp.asarray(edge_index[0])]
    dst_c = cluster_j[jnp.asarray(edge_index[1])]
    keep = (src_c != dst_c).astype(f32)
    a_c = jnp.zeros((num_clusters, num_clusters), f32).at[dst_c, src_c].add(keep)
    a_c = normalize_adj(a_c).astype(bf16)

    # batch = scatter(batch, perm, reduce='max'); global_mean_pool matrix
    batch_c = jax.ops.segment_max(jnp.asarray(batch_np, jnp.int32), cluster_j,
                                  num_segments=num_clusters)
    onehot_b = (batch_c[None, :] == jnp.arange(num_graphs)[:, None]).astype(f32)
    pool_b = (onehot_b / jnp.maximum(jnp.sum(onehot_b, axis=1, keepdims=True), 1.0)).astype(bf16)

    # ---- lane-dense (128-wide) zero padding + bf16 weight cast ----
    xp = _pad2(x.astype(f32), num_nodes, F).astype(bf16)

    def wpad(w):   # (fi, fo) -> (F, F) bf16, zero-padded (mathematically inert)
        return _pad2(w, F, F).astype(bf16)

    def vpad(v):   # (1, fo) -> (1, F) f32
        return _pad2(v, 1, F).astype(f32)

    # ---- fused kernel 1: pre-coarsen GCN (2 layers) + mean-pool + projection ----
    xc = pre_block(a, xp,
                   wpad(params["pre_w1"]), vpad(params["pre_b1"]),
                   vpad(params["pre_g1"]), vpad(params["pre_bt1"]),
                   wpad(params["pre_w2"]), vpad(params["pre_b2"]),
                   p_mean, wpad(params["proj_w"]), vpad(params["proj_b"]))

    # ---- fused kernel 2: post-coarsen GCN (3 layers) + MLPGraphHead ----
    out = post_block(a_c, xc,
                     wpad(params["post_w1"]), vpad(params["post_b1"]),
                     vpad(params["post_g1"]), vpad(params["post_bt1"]),
                     wpad(params["post_w2"]), vpad(params["post_b2"]),
                     vpad(params["post_g2"]), vpad(params["post_bt2"]),
                     wpad(params["post_w3"]), vpad(params["post_b3"]),
                     pool_b,
                     wpad(params["h_w1"]), vpad(params["h_b1"]),
                     wpad(params["h_w2"]), vpad(params["h_b2"]),
                     wpad(params["h_w3"]), vpad(params["h_b3"]))

    return out[:, :out_ch]       # slice back to logical out_channels


# ----------------------------------------------------------------------------
if __name__ == "__main__":
    in_channels, hidden_channels, out_channels = 4, 32, 3
    n_clusters = 5
    num_graphs, nodes_per_graph = 2, 8
    num_nodes = num_graphs * nodes_per_graph  # 16

    key = jax.random.PRNGKey(0)
    k_x, k_p = jax.random.split(key)

    # node features (N, F)
    x = jax.random.normal(k_x, (num_nodes, in_channels), jnp.float32)

    # batch vector: graph id per node
    batch_np = np.repeat(np.arange(num_graphs, dtype=np.int32), nodes_per_graph)

    # ring graph inside each example, undirected (both directions) -> (2, 32)
    edges = []
    for g in range(num_graphs):
        base = g * nodes_per_graph
        for i in range(nodes_per_graph):
            u = base + i
            v = base + (i + 1) % nodes_per_graph
            edges.append((u, v))
            edges.append((v, u))
    edge_index = np.asarray(edges, dtype=np.int32).T  # (2, E)

    params = init_params(k_p, in_channels, hidden_channels, out_channels)

    out = gcn_with_coarsening_forward(params, x, edge_index, batch_np, n_clusters)
    out = jax.block_until_ready(out)
    assert out.shape == (num_graphs, out_channels) and out.dtype == jnp.float32
    assert bool(jnp.all(jnp.isfinite(out)))
    print("KERNEL_OK")
</pallas_src>

<mosaic_0001>
module attributes {stable_mosaic.version = 11 : i64} {
  func.func @_pre_block_kernel(%arg0: memref<16x16xbf16, #tpu.memory_space<vmem>>, %arg1: memref<16x128xbf16, #tpu.memory_space<vmem>>, %arg2: memref<128x128xbf16, #tpu.memory_space<vmem>>, %arg3: memref<1x128xf32, #tpu.memory_space<vmem>>, %arg4: memref<1x128xf32, #tpu.memory_space<vmem>>, %arg5: memref<1x128xf32, #tpu.memory_space<vmem>>, %arg6: memref<128x128xbf16, #tpu.memory_space<vmem>>, %arg7: memref<1x128xf32, #tpu.memory_space<vmem>>, %arg8: memref<10x16xbf16, #tpu.memory_space<vmem>>, %arg9: memref<128x128xbf16, #tpu.memory_space<vmem>>, %arg10: memref<1x128xf32, #tpu.memory_space<vmem>>, %arg11: memref<10x128xbf16, #tpu.memory_space<vmem>>) attributes {dimension_semantics = [], scalar_prefetch = 0 : i64, scratch_operands = 0 : i64, tpu.core_type = #tpu.core_type<tc>} {
    %c0 = arith.constant 0 : index
    %c0_0 = arith.constant 0 : index
    %0 = vector.load %arg0[%c0, %c0_0] : memref<16x16xbf16, #tpu.memory_space<vmem>>, vector<16x16xbf16>
    %c0_1 = arith.constant 0 : index
    %c0_2 = arith.constant 0 : index
    %1 = vector.load %arg1[%c0_1, %c0_2] : memref<16x128xbf16, #tpu.memory_space<vmem>>, vector<16x128xbf16>
    %cst = arith.constant dense<0.000000e+00> : vector<16x128xf32>
    %2 = tpu.matmul %0, %1, %cst {dimension_numbers = #tpu.dot_dimension_numbers<[1], [0], [0], [1], [0, 0, 1, 1], [], []>} : vector<16x16xbf16>, vector<16x128xbf16>, vector<16x128xf32> -> vector<16x128xf32>
    %c0_3 = arith.constant 0 : index
    %c0_4 = arith.constant 0 : index
    %3 = vector.load %arg2[%c0_3, %c0_4] : memref<128x128xbf16, #tpu.memory_space<vmem>>, vector<128x128xbf16>
    %4 = arith.truncf %2 : vector<16x128xf32> to vector<16x128xbf16>
    %cst_5 = arith.constant dense<0.000000e+00> : vector<16x128xf32>
    %5 = tpu.matmul %4, %3, %cst_5 {dimension_numbers = #tpu.dot_dimension_numbers<[1], [0], [0], [1], [0, 0, 1, 1], [], []>} : vector<16x128xbf16>, vector<128x128xbf16>, vector<16x128xf32> -> vector<16x128xf32>
    %c0_6 = arith.constant 0 : index
    %c0_7 = arith.constant 0 : index
    %6 = vector.load %arg3[%c0_6, %c0_7] : memref<1x128xf32, #tpu.memory_space<vmem>>, vector<1x128xf32>
    %7 = vector.broadcast %6 : vector<1x128xf32> to vector<16x128xf32>
    %8 = arith.addf %5, %7 : vector<16x128xf32>
    %c0_8 = arith.constant 0 : index
    %c0_9 = arith.constant 0 : index
    %9 = vector.load %arg4[%c0_8, %c0_9] : memref<1x128xf32, #tpu.memory_space<vmem>>, vector<1x128xf32>
    %c0_10 = arith.constant 0 : index
    %c0_11 = arith.constant 0 : index
    %10 = vector.load %arg5[%c0_10, %c0_11] : memref<1x128xf32, #tpu.memory_space<vmem>>, vector<1x128xf32>
    %cst_12 = arith.constant dense<0.000000e+00> : vector<128xf32>
    %11 = vector.multi_reduction <add>, %8, %cst_12 [0] : vector<16x128xf32> to vector<128xf32>
    %12 = vector.shape_cast %11 : vector<128xf32> to vector<1x128xf32>
    %cst_13 = arith.constant 1.600000e+01 : f32
    %13 = vector.broadcast %cst_13 : f32 to vector<1x128xf32>
    %14 = arith.divf %12, %13 : vector<1x128xf32>
    %15 = vector.broadcast %14 : vector<1x128xf32> to vector<16x128xf32>
    %16 = arith.subf %8, %15 : vector<16x128xf32>
    %17 = arith.mulf %16, %16 : vector<16x128xf32>
    %cst_14 = arith.constant dense<0.000000e+00> : vector<128xf32>
    %18 = vector.multi_reduction <add>, %17, %cst_14 [0] : vector<16x128xf32> to vector<128xf32>
    %19 = vector.shape_cast %18 : vector<128xf32> to vector<1x128xf32>
    %cst_15 = arith.constant 1.600000e+01 : f32
    %20 = vector.broadcast %cst_15 : f32 to vector<1x128xf32>
    %21 = arith.divf %19, %20 : vector<1x128xf32>
    %22 = vector.broadcast %14 : vector<1x128xf32> to vector<16x128xf32>
    %23 = arith.subf %8, %22 : vector<16x128xf32>
    %cst_16 = arith.constant 9.99999974E-6 : f32
    %24 = vector.broadcast %cst_16 : f32 to vector<1x128xf32>
    %25 = arith.addf %21, %24 : vector<1x128xf32>
    %26 = math.rsqrt %25 : vector<1x128xf32>
    %27 = vector.broadcast %26 : vector<1x128xf32> to vector<16x128xf32>
    %28 = arith.mulf %23, %27 : vector<16x128xf32>
    %29 = vector.broadcast %9 : vector<1x128xf32> to vector<16x128xf32>
    %30 = arith.mulf %28, %29 : vector<16x128xf32>
    %31 = vector.broadcast %10 : vector<1x128xf32> to vector<16x128xf32>
    %32 = arith.addf %30, %31 : vector<16x128xf32>
    %cst_17 = arith.constant 5.000000e-01 : f32
    %33 = vector.broadcast %cst_17 : f32 to vector<16x128xf32>
    %34 = arith.mulf %33, %32 : vector<16x128xf32>
    %cst_18 = arith.constant 0.707106769 : f32
    %35 = vector.broadcast %cst_18 : f32 to vector<16x128xf32>
    %36 = arith.mulf %32, %35 : vector<16x128xf32>
    %cst_19 = arith.constant -3.92572403 : f32
    %cst_20 = arith.constant 3.92572403 : f32
    %37 = vector.broadcast %cst_19 : f32 to vector<16x128xf32>
    %38 = arith.maximumf %37, %36 : vector<16x128xf32>
    %39 = vector.broadcast %cst_20 : f32 to vector<16x128xf32>
    %40 = arith.minimumf %39, %38 : vector<16x128xf32>
    %41 = arith.mulf %40, %40 : vector<16x128xf32>
    %cst_21 = arith.constant -2.72614237E-10 : f32
    %42 = vector.broadcast %cst_21 : f32 to vector<16x128xf32>
    %43 = arith.mulf %42, %41 : vector<16x128xf32>
    %cst_22 = arith.constant 2.77068146E-8 : f32
    %44 = vector.broadcast %cst_22 : f32 to vector<16x128xf32>
    %45 = arith.addf %43, %44 : vector<16x128xf32>
    %46 = arith.mulf %45, %41 : vector<16x128xf32>
    %cst_23 = arith.constant -2.10102394E-6 : f32
    %47 = vector.broadcast %cst_23 : f32 to vector<16x128xf32>
    %48 = arith.addf %46, %47 : vector<16x128xf32>
    %49 = arith.mulf %48, %41 : vector<16x128xf32>
    %cst_24 = arith.constant -5.69250624E-5 : f32
    %50 = vector.broadcast %cst_24 : f32 to vector<16x128xf32>
    %51 = arith.addf %49, %50 : vector<16x128xf32>
    %52 = arith.mulf %51, %41 : vector<16x128xf32>
    %cst_25 = arith.constant -7.34990637E-4 : f32
    %53 = vector.broadcast %cst_25 : f32 to vector<16x128xf32>
    %54 = arith.addf %52, %53 : vector<16x128xf32>
    %55 = arith.mulf %54, %41 : vector<16x128xf32>
    %cst_26 = arith.constant -2.954600e-03 : f32
    %56 = vector.broadcast %cst_26 : f32 to vector<16x128xf32>
    %57 = arith.addf %55, %56 : vector<16x128xf32>
    %58 = arith.mulf %57, %41 : vector<16x128xf32>
    %cst_27 = arith.constant -0.0160960332 : f32
    %59 = vector.broadcast %cst_27 : f32 to vector<16x128xf32>
    %60 = arith.addf %58, %59 : vector<16x128xf32>
    %61 = arith.mulf %60, %40 : vector<16x128xf32>
    %cst_28 = arith.constant -1.45660715E-5 : f32
    %62 = vector.broadcast %cst_28 : f32 to vector<16x128xf32>
    %63 = arith.mulf %62, %41 : vector<16x128xf32>
    %cst_29 = arith.constant -2.13374049E-4 : f32
    %64 = vector.broadcast %cst_29 : f32 to vector<16x128xf32>
    %65 = arith.addf %63, %64 : vector<16x128xf32>
    %66 = arith.mulf %65, %41 : vector<16x128xf32>
    %cst_30 = arith.constant -0.00168282702 : f32
    %67 = vector.broadcast %cst_30 : f32 to vector<16x128xf32>
    %68 = arith.addf %66, %67 : vector<16x128xf32>
    %69 = arith.mulf %68, %41 : vector<16x128xf32>
    %cst_31 = arith.constant -0.00737332925 : f32
    %70 = vector.broadcast %cst_31 : f32 to vector<16x128xf32>
    %71 = arith.addf %69, %70 : vector<16x128xf32>
    %72 = arith.mulf %71, %41 : vector<16x128xf32>
    %cst_32 = arith.constant -0.0142647391 : f32
    %73 = vector.broadcast %cst_32 : f32 to vector<16x128xf32>
    %74 = arith.addf %72, %73 : vector<16x128xf32>
    %75 = arith.divf %61, %74 : vector<16x128xf32>
    %cst_33 = arith.constant 1.000000e+00 : f32
    %76 = vector.broadcast %cst_33 : f32 to vector<16x128xf32>
    %77 = arith.addf %76, %75 : vector<16x128xf32>
    %78 = arith.mulf %34, %77 : vector<16x128xf32>
    %79 = arith.truncf %78 : vector<16x128xf32> to vector<16x128xbf16>
    %cst_34 = arith.constant dense<0.000000e+00> : vector<16x128xf32>
    %80 = tpu.matmul %0, %79, %cst_34 {dimension_numbers = #tpu.dot_dimension_numbers<[1], [0], [0], [1], [0, 0, 1, 1], [], []>} : vector<16x16xbf16>, vector<16x128xbf16>, vector<16x128xf32> -> vector<16x128xf32>
    %c0_35 = arith.constant 0 : index
    %c0_36 = arith.constant 0 : index
    %81 = vector.load %arg6[%c0_35, %c0_36] : memref<128x128xbf16, #tpu.memory_space<vmem>>, vector<128x128xbf16>
    %82 = arith.truncf %80 : vector<16x128xf32> to vector<16x128xbf16>
    %cst_37 = arith.constant dense<0.000000e+00> : vector<16x128xf32>
    %83 = tpu.matmul %82, %81, %cst_37 {dimension_numbers = #tpu.dot_dimension_numbers<[1], [0], [0], [1], [0, 0, 1, 1], [], []>} : vector<16x128xbf16>, vector<128x128xbf16>, vector<16x128xf32> -> vector<16x128xf32>
    %c0_38 = arith.constant 0 : index
    %c0_39 = arith.constant 0 : index
    %84 = vector.load %arg7[%c0_38, %c0_39] : memref<1x128xf32, #tpu.memory_space<vmem>>, vector<1x128xf32>
    %85 = vector.broadcast %84 : vector<1x128xf32> to vector<16x128xf32>
    %86 = arith.addf %83, %85 : vector<16x128xf32>
    %c0_40 = arith.constant 0 : index
    %c0_41 = arith.constant 0 : index
    %87 = vector.load %arg8[%c0_40, %c0_41] : memref<10x16xbf16, #tpu.memory_space<vmem>>, vector<10x16xbf16>
    %88 = arith.truncf %86 : vector<16x128xf32> to vector<16x128xbf16>
    %cst_42 = arith.constant dense<0.000000e+00> : vector<10x128xf32>
    %89 = tpu.matmul %87, %88, %cst_42 {dimension_numbers = #tpu.dot_dimension_numbers<[1], [0], [0], [1], [0, 0, 1, 1], [], []>} : vector<10x16xbf16>, vector<16x128xbf16>, vector<10x128xf32> -> vector<10x128xf32>
    %c0_43 = arith.constant 0 : index
    %c0_44 = arith.constant 0 : index
    %90 = vector.load %arg9[%c0_43, %c0_44] : memref<128x128xbf16, #tpu.memory_space<vmem>>, vector<128x128xbf16>
    %91 = arith.truncf %89 : vector<10x128xf32> to vector<10x128xbf16>
    %cst_45 = arith.constant dense<0.000000e+00> : vector<10x128xf32>
    %92 = tpu.matmul %91, %90, %cst_45 {dimension_numbers = #tpu.dot_dimension_numbers<[1], [0], [0], [1], [0, 0, 1, 1], [], []>} : vector<10x128xbf16>, vector<128x128xbf16>, vector<10x128xf32> -> vector<10x128xf32>
    %c0_46 = arith.constant 0 : index
    %c0_47 = arith.constant 0 : index
    %93 = vector.load %arg10[%c0_46, %c0_47] : memref<1x128xf32, #tpu.memory_space<vmem>>, vector<1x128xf32>
    %94 = vector.broadcast %93 : vector<1x128xf32> to vector<10x128xf32>
    %95 = arith.addf %92, %94 : vector<10x128xf32>
    %96 = arith.truncf %95 : vector<10x128xf32> to vector<10x128xbf16>
    %c0_48 = arith.constant 0 : index
    %c0_49 = arith.constant 0 : index
    %97 = vector.load %arg11[%c0_48, %c0_49] : memref<10x128xbf16, #tpu.memory_space<vmem>>, vector<10x128xbf16>
    tpu.vector_store %arg11[%c0_48, %c0_49], %96 {strides = array<i32>} : memref<10x128xbf16, #tpu.memory_space<vmem>>, vector<10x128xbf16>,
    return
  }
}

</mosaic_0001>

<bundles_post_ra>
// kernel: tpu_custom_call.1
= control target key start
LH: loop header
LB: loop body
LE: loop exit
PB: predicated region body
PF: predicated region fallthrough
CT: control target
= control target key end

     0   :  { %16 = vsyncpa [#allocation3], 0  ;;  %s1113_s0 = inlined_call_operand.hbm [shape: bf16[16,16], index: 0, kind: input, shape index: {}]   ;;  %s1114_s1 = inlined_call_operand.hbm [shape: bf16[16,128], index: 1, kind: input, shape index: {}]   ;;  %s1115_s2 = inlined_call_operand.hbm [shape: bf16[128,128], index: 2, kind: input, shape index: {}]   ;;  %s1116_s3 = inlined_call_operand.vmem [shape: f32[1,128], index: 3, kind: input, shape index: {}]   ;;  %s1117_s4 = inlined_call_operand.vmem [shape: f32[1,128], index: 4, kind: input, shape index: {}]   ;;  %s1118_s5 = inlined_call_operand.vmem [shape: f32[1,128], index: 5, kind: input, shape index: {}]   ;;  %s1119_s6 = inlined_call_operand.hbm [shape: bf16[128,128], index: 6, kind: input, shape index: {}]   ;;  %s1120_s7 = inlined_call_operand.vmem [shape: f32[1,128], index: 7, kind: input, shape index: {}]   ;;  %s1121_s8 = inlined_call_operand.hbm [shape: bf16[10,16], index: 8, kind: input, shape index: {}]   ;;  %s1122_s9 = inlined_call_operand.hbm [shape: bf16[128,128], index: 9, kind: input, shape index: {}]   ;;  %s1123_s10 = inlined_call_operand.vmem [shape: f32[1,128], index: 10, kind: input, shape index: {}]   ;;  %s1124_s11 = inlined_call_operand.hbm [shape: bf16[10,128], index: 11, kind: output, shape index: {}]  }
   0x1   :  { %17 = vsyncpa [#allocation6], 0 }
   0x2   :  { %18 = vsyncpa [#allocation9], 0 }
   0x3   :  { %19 = vsyncpa [#allocation12], 0 }
   0x4   :  { %20 = vsyncpa [#allocation4], 0  ;;  %s38_s19 = sshll.u32 %s1114_s1, 4  ;;  %s961_s20 = smov [#allocation5]   ;;  %s39_s19 = int_to_ptr.hbm [resolvable:$true] %s38_s19 }
   0x5   :  { %s40_s21 = sshll.u32 %s961_s20, 4  ;;  %s70_s24 = sshll.u32 %s1119_s6, 4  ;;  %s41_s21 = int_to_ptr.vmem [resolvable:$true] %s40_s21  ;;  %s71_s24 = int_to_ptr.hbm [resolvable:$true] %s70_s24 }
   0x6   :  { %s962_s25 = smov 64   ;;  %s963_s26 = smov 4  }
   0x7   :  { %46 = dma.hbm_to_vmem [thread:$0]  %s39_s19, 128, %s41_s21, [#allocation6], %s962_s25, %s962_s25, %s963_s26  }
   0x8   :  { %s964_s27 = smov [#allocation8]   ;;  %s25_s1 = sshll.u32 %s1113_s0, 4  ;;  %s26_s1 = int_to_ptr.hbm [resolvable:$true] %s25_s1 }
   0x9   :  { %s72_s28 = sshll.u32 %s964_s27, 4  ;;  %s51_s13 = sshll.u32 %s1115_s2, 4  ;;  %s73_s28 = int_to_ptr.vmem [resolvable:$true] %s72_s28  ;;  %s52_s13 = int_to_ptr.hbm [resolvable:$true] %s51_s13 }
   0xa   :  { %78 = dma.hbm_to_vmem [thread:$0]  %s71_s24, 1024, %s73_s28, [#allocation9], %s962_s25, %s962_s25, %s963_s26  }
   0xb   :  { %s965_s14 = smov [#allocation2]   ;;  %s966_s16 = smov [#allocation7]  }
   0xc   :  { %s27_s15 = sshll.u32 %s965_s14, 4  ;;  %s53_s0 = sshll.u32 %s966_s16, 4  ;;  %s28_s15 = int_to_ptr.vmem [resolvable:$true] %s27_s15  ;;  %s54_s0 = int_to_ptr.vmem [resolvable:$true] %s53_s0 }
   0xd   :  { %33 = dma.hbm_to_vmem [thread:$0]  %s26_s1, 128, %s28_s15, [#allocation3], %s962_s25, %s962_s25, %s963_s26  }
   0xe   :  { %s85_s19 = sshll.u32 %s1121_s8, 4  ;;  %s98_s21 = sshll.u32 %s1122_s9, 4  ;;  %s86_s19 = int_to_ptr.hbm [resolvable:$true] %s85_s19  ;;  %s99_s21 = int_to_ptr.hbm [resolvable:$true] %s98_s21 }
   0xf   :  { %59 = dma.hbm_to_vmem [thread:$0]  %s52_s13, 1024, %s54_s0, [#allocation6], %s962_s25, %s962_s25, %s963_s26  }
  0x10   :  { %s967_s22 = smov [#allocation10]   ;;  %s968_s24 = smov [#allocation11]  }
  0x11   :  { %s87_s23 = sshll.u32 %s967_s22, 4  ;;  %s100_s8 = sshll.u32 %s968_s24, 4  ;;  %s88_s23 = int_to_ptr.vmem [resolvable:$true] %s87_s23  ;;  %s101_s8 = int_to_ptr.vmem [resolvable:$true] %s100_s8 }
  0x12   :  { %93 = dma.hbm_to_vmem [thread:$0]  %s86_s19, 128, %s88_s23, [#allocation9], %s962_s25, %s962_s25, %s963_s26  }
  0x13   :  { %106 = dma.hbm_to_vmem [thread:$0]  %s99_s21, 1024, %s101_s8, [#allocation12], %s962_s25, %s962_s25, %s963_s26  }
  0x14   :  { %951 = dma.done.wait [#allocation3], 128  }
  0x15   :  { %952 = vsyncadd [#allocation3], 4294967168 }
  0x16   :  { %953 = dma.done.wait [#allocation6], 1152  }
  0x17   :  { %954 = vsyncadd [#allocation6], 4294966144 }
  0x18   :  { %955 = dma.done.wait [#allocation9], 1152  }
  0x19   :  { %956 = vsyncadd [#allocation9], 4294966144 }
  0x1a   :  { %957 = dma.done.wait [#allocation12], 1024  }
  0x1b   :  { %958 = vsyncadd [#allocation12], 4294966272  ;;  %v734_v0 = vld [vmem:[#allocation5] sm:$0xff]  ;;  %v1067_v2 = vld [vmem:[#allocation2] sm:$0xff]  ;;  %vm149_vm0 = vcmask 130048   ;;  %v969_v13 = vmov 16.0  }
  0x1c   :  { %v742_v1 = vld [vmem:[#allocation7 + $0x38] sm:$0xff]  ;;  %160 = vmatpush.bf16.msra.mxu0 %v734_v0  ;;  %v741_v3 = vld [vmem:[#allocation7 + $0x30] sm:$0xff]  ;;  %v740_v4 = vld [vmem:[#allocation7 + $0x28] sm:$0xff]  ;;  %775 = vrcp.f32 %v969_v13  ;;  %s970_s6 = smov [#allocation13]   ;;  %s604_s15 = sshll.u32 %s1124_s11, 4  ;;  %s605_s15 = int_to_ptr.hbm [resolvable:$true] %s604_s15 }
  0x1d   :  { %236 = vmatpush.bf16.msra.mxu1 %v742_v1  ;;  %v739_v5 = vld [vmem:[#allocation7 + $0x20] sm:$0xff]  ;;  %v738_v6 = vld [vmem:[#allocation7 + $0x18] sm:$0xff]  ;;  %v737_v7 = vld [vmem:[#allocation7 + $0x10] sm:$0xff]  ;;  %s602_s12 = sshll.u32 %s970_s6, 4  ;;  %s603_s12 = int_to_ptr.vmem [resolvable:$true] %s602_s12 }
  0x1e   :  { %v736_v8 = vld [vmem:[#allocation7 + $0x8] sm:$0xff]  ;;  %v735_v9 = vld [vmem:[#allocation7] sm:$0xff]  ;;  %v770_v16 = vld [vmem:[%s1116_s3] ss:$0 sm:$0xff] }
  0x1f   :  { %628 = vmatmul.msk.bf16.vlgmr.msra.gmra.mxu0 %vm149_vm0, %v1067_v2  ;;  %v771_v52 = vld [vmem:[%s1117_s4] ss:$0 sm:$0xff] }
  0x20   :  { %v772_v56 = vld [vmem:[%s1118_s5] ss:$0 sm:$0xff] }
  0x21   :  { %237 = vmatpush.bf16.msra.mxu1 %v741_v3 }
  0x22   :  { %v776_v15 = vpop.eup %775 }
  0x23   :  { %v260_v17 = vmul.f32 16.0, %v776_v15  ;;  %vm264_vm1 = vweird.f32 %v776_v15 }
  0x25   :  { %238 = vmatpush.bf16.msra.mxu1 %v740_v4  ;;  %v261_v21 = vsub.f32 1.0, %v260_v17 }
  0x27   :  { %v262_v24 = vmul.f32 %v776_v15, %v261_v21 }
  0x29   :  { %239 = vmatpush.bf16.msra.mxu1 %v739_v5  ;;  %v263_v27 = vadd.f32 %v776_v15, %v262_v24 }
  0x2b   :  { %v265_v30 = vsel %vm264_vm1, %v776_v15, %v263_v27 }
  0x2d   :  { %240 = vmatpush.bf16.msra.mxu1 %v738_v6 }
  0x31   :  { %241 = vmatpush.bf16.msra.mxu1 %v737_v7 }
  0x35   :  { %242 = vmatpush.bf16.msra.mxu1 %v736_v8 }
  0x39   :  { %243 = vmatpush.bf16.msra.mxu1 %v735_v9 }
  0x9c   :  { %v162_v10 = vpop.f32.mrf.mxu0 }
  0xa4   :  { %v164_v11 = vpop.f32.mrf.mxu0 }
  0xa5   :  { %v183_v12 = vpack.c.bf16 %v164_v11, %v162_v10 }
  0xa7   :  { %244 = vmatmul.bf16.vlgmr.msra.gmra.mxu1 %v183_v12 }
 0x124   :  { %v245_v14 = vpop.f32.mrf.mxu1 }
 0x125   :  { %v246_v19 = vadd.f32 %v770_v16, %v245_v14 }
 0x12c   :  { %v247_v18 = vpop.f32.mrf.mxu1 }
 0x12d   :  { %v248_v20 = vadd.f32 %v770_v16, %v247_v18 }
 0x12f   :  { %v252_v22 = vadd.f32 %v248_v20, %v246_v19 }
 0x131   :  { %v253_v23 = vrot.slane %v252_v22, 4 }
 0x133   :  { %v254_v25 = vadd.f32 %v253_v23, %v252_v22 }
 0x135   :  { %v255_v26 = vrot.slane %v254_v25, 2 }
 0x137   :  { %v256_v28 = vadd.f32 %v255_v26, %v254_v25 }
 0x139   :  { %v257_v29 = vrot.slane %v256_v28, 1 }
 0x13b   :  { %v258_v31 = vadd.f32 %v257_v29, %v256_v28 }
 0x13d   :  { %v266_v32 = vmul.f32 %v265_v30, %v258_v31 }
 0x13f   :  { %v267_v33 = vsub.f32 %v246_v19, %v266_v32  ;;  %v268_v34 = vsub.f32 %v248_v20, %v266_v32  ;;  %v750_v32 = vld [vmem:[#allocation8 + $0x38] sm:$0xff] }
 0x140   :  { %472 = vmatpush.bf16.msra.mxu3 %v750_v32  ;;  %v698_v32 = vld [vmem:[#allocation10] sm:$0xf] }
 0x141   :  { %v269_v35 = vmul.f32 %v267_v33, %v267_v33  ;;  %v270_v36 = vmul.f32 %v268_v34, %v268_v34 }
 0x143   :  { %v271_v37 = vadd.f32 %v270_v36, %v269_v35 }
 0x145   :  { %v272_v38 = vrot.slane %v271_v37, 4 }
 0x147   :  { %v273_v39 = vadd.f32 %v272_v38, %v271_v37  ;;  %v749_v37 = vld [vmem:[#allocation8 + $0x30] sm:$0xff] }
 0x148   :  { %473 = vmatpush.bf16.msra.mxu3 %v749_v37  ;;  %v753_v37 = vld [vmem:[#allocation11 + $0x8] sm:$0xff] }
 0x149   :  { %v274_v40 = vrot.slane %v273_v39, 2 }
 0x14b   :  { %v275_v41 = vadd.f32 %v274_v40, %v273_v39 }
 0x14d   :  { %v276_v42 = vrot.slane %v275_v41, 1 }
 0x14f   :  { %v277_v43 = vadd.f32 %v276_v42, %v275_v41  ;;  %v748_v41 = vld [vmem:[#allocation8 + $0x28] sm:$0xff] }
 0x150   :  { %474 = vmatpush.bf16.msra.mxu3 %v748_v41 }
 0x151   :  { %v278_v44 = vmul.f32 %v277_v43, %v265_v30 }
 0x153   :  { %v279_v45 = vadd.f32 1e-05, %v278_v44 }
 0x155   :  { %777 = vrsqrt.f32 %v279_v45  ;;  %vm286_vm3 = vweird.f32 %v279_v45 }
 0x15b   :  { %v778_v46 = vpop.eup %777 }
 0x15c   :  { %v281_v47 = vmul.f32 %v778_v46, %v279_v45  ;;  %vm287_vm2 = vweird.f32 %v778_v46 }
 0x15d   :  { %vm288_vm4 = vmor %vm286_vm3, %vm287_vm2 }
 0x15e   :  { %v282_v48 = vmul.f32 %v778_v46, %v281_v47  ;;  %v747_v47 = vld [vmem:[#allocation8 + $0x20] sm:$0xff] }
 0x15f   :  { %475 = vmatpush.bf16.msra.mxu3 %v747_v47 }
 0x160   :  { %v283_v49 = vmul.f32 0.5, %v282_v48 }
 0x162   :  { %v284_v50 = vsub.f32 1.5, %v283_v49 }
 0x164   :  { %v285_v51 = vmul.f32 %v778_v46, %v284_v50 }
 0x166   :  { %v289_v53 = vsel %vm288_vm4, %v778_v46, %v285_v51 }
 0x167   :  { %v290_v54 = vmul.f32 %v289_v53, %v267_v33  ;;  %v291_v55 = vmul.f32 %v289_v53, %v268_v34 }
 0x169   :  { %v296_v57 = vmul.f32 %v771_v52, %v291_v55  ;;  %v295_v58 = vmul.f32 %v771_v52, %v290_v54 }
 0x16b   :  { %v1080_v59 = vadd.f32 %v772_v56, %v295_v58  ;;  %v1082_v60 = vadd.f32 %v772_v56, %v296_v57  ;;  %v746_v57 = vld [vmem:[#allocation8 + $0x18] sm:$0xff] }
 0x16c   :  { %476 = vmatpush.bf16.msra.mxu3 %v746_v57 }
 0x16d   :  { %v304_v61 = vmul.f32 0.70710677, %v1080_v59  ;;  %v305_v62 = vmul.f32 0.70710677, %v1082_v60 }
 0x16f   :  { %v1086_v63 = vclamps-f32 %v304_v61, 3.925724  ;;  %v1088_v0 = vclamps-f32 %v305_v62, 3.925724 }
 0x171   :  { %v310_v1 = vmul.f32 %v1086_v63, %v1086_v63  ;;  %v311_v3 = vmul.f32 %v1088_v0, %v1088_v0 }
 0x173   :  { %v312_v4 = vmul.f32 -2.7261424e-10, %v310_v1  ;;  %v313_v5 = vmul.f32 -2.7261424e-10, %v311_v3  ;;  %v338_v6 = vmul.f32 -1.45660715e-05, %v310_v1 }
 0x174   :  { %v339_v7 = vmul.f32 -1.45660715e-05, %v311_v3 }
 0x175   :  { %v314_v8 = vadd.f32 2.7706815e-08, %v312_v4  ;;  %v315_v9 = vadd.f32 2.7706815e-08, %v313_v5  ;;  %v340_v10 = vadd.f32 -0.00021337405, %v338_v6 }
 0x176   :  { %v341_v11 = vadd.f32 -0.00021337405, %v339_v7 }
 0x177   :  { %v316_v12 = vmul.f32 %v314_v8, %v310_v1  ;;  %v317_v13 = vmul.f32 %v315_v9, %v311_v3  ;;  %v342_v14 = vmul.f32 %v340_v10, %v310_v1 }
 0x178   :  { %v343_v15 = vmul.f32 %v341_v11, %v311_v3 }
 0x179   :  { %v318_v16 = vadd.f32 -2.101024e-06, %v316_v12  ;;  %v319_v17 = vadd.f32 -2.101024e-06, %v317_v13  ;;  %v344_v18 = vadd.f32 -0.001682827, %v342_v14 }
 0x17a   :  { %v345_v19 = vadd.f32 -0.001682827, %v343_v15  ;;  %v302_v14 = vmul.f32 0.5, %v1080_v59 }
 0x17b   :  { %v320_v20 = vmul.f32 %v318_v16, %v310_v1  ;;  %v321_v21 = vmul.f32 %v319_v17, %v311_v3  ;;  %v346_v22 = vmul.f32 %v344_v18, %v310_v1  ;;  %v303_v16 = vmul.f32 0.5, %v1082_v60  ;;  %v758_v60 = vld [vmem:[#allocation11 + $0x30] sm:$0xff] }
 0x17c   :  { %v347_v23 = vmul.f32 %v345_v19, %v311_v3 }
 0x17d   :  { %v322_v24 = vadd.f32 -5.6925062e-05, %v320_v20  ;;  %v323_v25 = vadd.f32 -5.6925062e-05, %v321_v21  ;;  %v348_v26 = vadd.f32 -0.0073733293, %v346_v22 }
 0x17e   :  { %v349_v27 = vadd.f32 -0.0073733293, %v347_v23  ;;  %v744_v20 = vld [vmem:[#allocation8 + $0x8] sm:$0xff]  ;;  %v743_v21 = vld [vmem:[#allocation8] sm:$0xff] }
 0x17f   :  { %v324_v28 = vmul.f32 %v322_v24, %v310_v1  ;;  %v325_v29 = vmul.f32 %v323_v25, %v311_v3  ;;  %v350_v30 = vmul.f32 %v348_v26, %v310_v1  ;;  %v759_v24 = vld [vmem:[#allocation11 + $0x38] sm:$0xff]  ;;  %v757_v25 = vld [vmem:[#allocation11 + $0x28] sm:$0xff]  ;;  %v756_v26 = vld [vmem:[#allocation11 + $0x20] sm:$0xff] }
 0x180   :  { %v351_v31 = vmul.f32 %v349_v27, %v311_v3  ;;  %v755_v27 = vld [vmem:[#allocation11 + $0x18] sm:$0xff] }
 0x181   :  { %v326_v33 = vadd.f32 -0.00073499064, %v324_v28  ;;  %v327_v34 = vadd.f32 -0.00073499064, %v325_v29  ;;  %v352_v35 = vadd.f32 -0.014264739, %v350_v30 }
 0x182   :  { %v353_v36 = vadd.f32 -0.014264739, %v351_v31  ;;  %v773_v28 = vld [vmem:[%s1120_s7] ss:$0 sm:$0xff] }
 0x183   :  { %v328_v38 = vmul.f32 %v326_v33, %v310_v1  ;;  %v329_v39 = vmul.f32 %v327_v34, %v311_v3  ;;  %779 = vrcp.f32 %v352_v35  ;;  %v363_v51 = vand.u32 2147483647, %v352_v35  ;;  %v751_v33 = vld [vmem:[#allocation10] sm:$0x10] }
 0x184   :  { %781 = vrcp.f32 %v353_v36  ;;  %v365_v52 = vand.u32 2147483648, %v352_v35  ;;  %v380_v56 = vand.u32 2147483648, %v353_v36  ;;  %v378_v62 = vand.u32 2147483647, %v353_v36 }
 0x185   :  { %v330_v40 = vadd.f32 -0.0029546, %v328_v38  ;;  %v331_v42 = vadd.f32 -0.0029546, %v329_v39  ;;  %vm359_vm7 = vweird.f32 %v352_v35  ;;  %vm374_vm9 = vweird.f32 %v353_v36  ;;  %v752_v38 = vld [vmem:[#allocation11] sm:$0xff] }
 0x186   :  { %v366_v4 = vor.u32 1.1754944e-38, %v365_v52  ;;  %vm364_vm10 = vcmp.eq.f32.partialorder %v363_v51, 8.507059e+37  ;;  %v381_v7 = vor.u32 1.1754944e-38, %v380_v56  ;;  %vm379_vm12 = vcmp.eq.f32.partialorder %v378_v62, 8.507059e+37 }
 0x187   :  { %v332_v45 = vmul.f32 %v330_v40, %v310_v1  ;;  %v333_v48 = vmul.f32 %v331_v42, %v311_v3  ;;  %v774_v42 = vld [vmem:[%s1123_s10] ss:$0 sm:$0xff] }
 0x189   :  { %v780_v43 = vpop.eup %779  ;;  %v334_v54 = vadd.f32 -0.016096033, %v332_v45  ;;  %v335_v58 = vadd.f32 -0.016096033, %v333_v48 }
 0x18a   :  { %v782_v44 = vpop.eup %781  ;;  %v355_v46 = vmul.f32 %v780_v43, %v352_v35  ;;  %vm360_vm5 = vweird.f32 %v780_v43  ;;  %v699_v35 = vor.u32 %v751_v33, %v698_v32 }
 0x18b   :  { %v370_v49 = vmul.f32 %v782_v44, %v353_v36  ;;  %vm375_vm6 = vweird.f32 %v782_v44  ;;  %vm361_vm8 = vmor %vm359_vm7, %vm360_vm5  ;;  %v336_v5 = vmul.f32 %v1086_v63, %v334_v54  ;;  %v337_v8 = vmul.f32 %v1088_v0, %v335_v58  ;;  %v745_v0 = vld [vmem:[#allocation8 + $0x10] sm:$0xff]  ;;  %v754_v36 = vld [vmem:[#allocation11 + $0x10] sm:$0xff] }
 0x18c   :  { %v356_v50 = vsub.f32 1.0, %v355_v46  ;;  %vm376_vm11 = vmor %vm374_vm9, %vm375_vm6  ;;  %477 = vmatpush.bf16.msra.mxu3 %v745_v0 }
 0x18d   :  { %v371_v53 = vsub.f32 1.0, %v370_v49 }
 0x18e   :  { %v357_v55 = vmul.f32 %v780_v43, %v356_v50 }
 0x18f   :  { %v372_v61 = vmul.f32 %v782_v44, %v371_v53 }
 0x190   :  { %v358_v1 = vadd.f32 %v780_v43, %v357_v55  ;;  %478 = vmatpush.bf16.msra.mxu3 %v744_v20 }
 0x191   :  { %v373_v3 = vadd.f32 %v782_v44, %v372_v61 }
 0x192   :  { %v362_v6 = vsel %vm361_vm8, %v780_v43, %v358_v1 }
 0x193   :  { %v367_v9 = vsel %vm364_vm10, %v366_v4, %v362_v6  ;;  %v377_v10 = vsel %vm376_vm11, %v782_v44, %v373_v3 }
 0x194   :  { %v368_v11 = vmul.f32 %v367_v9, %v336_v5  ;;  %v382_v12 = vsel %vm379_vm12, %v381_v7, %v377_v10  ;;  %479 = vmatpush.bf16.msra.mxu3 %v743_v21 }
 0x195   :  { %v383_v13 = vmul.f32 %v382_v12, %v337_v8 }
 0x196   :  { %v384_v15 = vadd.f32 1.0, %v368_v11 }
 0x197   :  { %v385_v17 = vadd.f32 1.0, %v383_v13 }
 0x198   :  { %v386_v63 = vmul.f32 %v384_v15, %v302_v14 }
 0x199   :  { %v387_v18 = vmul.f32 %v385_v17, %v303_v16 }
 0x19b   :  { %v388_v19 = vpack.c.bf16 %v387_v18, %v386_v63 }
 0x19d   :  { %396 = vmatpush.bf16.msra.mxu2 %v388_v19 }
 0x1a0   :  { %663 = vmatmul.msk.bf16.vlgmr.msra.gmra.mxu2 %vm149_vm0, %v1067_v2 }
 0x1a1   :  { %580 = vmatpush.bf16.msrb.mxu2 %v759_v24 }
 0x1a5   :  { %581 = vmatpush.bf16.msrb.mxu2 %v758_v60 }
 0x1a9   :  { %582 = vmatpush.bf16.msrb.mxu2 %v757_v25 }
 0x1ad   :  { %583 = vmatpush.bf16.msrb.mxu2 %v756_v26 }
 0x1b1   :  { %584 = vmatpush.bf16.msrb.mxu2 %v755_v27 }
 0x1b5   :  { %585 = vmatpush.bf16.msrb.mxu2 %v754_v36 }
 0x1b9   :  { %586 = vmatpush.bf16.msrb.mxu2 %v753_v37 }
 0x1bd   :  { %587 = vmatpush.bf16.msrb.mxu2 %v752_v38 }
 0x223   :  { %v398_v22 = vpop.f32.mrf.mxu2 }
 0x22b   :  { %v400_v23 = vpop.f32.mrf.mxu2 }
 0x22c   :  { %v419_v59 = vpack.c.bf16 %v400_v23, %v398_v22 }
 0x22e   :  { %480 = vmatmul.bf16.vlgmr.msra.gmra.mxu3 %v419_v59 }
 0x2b1   :  { %v481_v2 = vpop.f32.mrf.mxu3 }
 0x2b2   :  { %v482_v30 = vadd.f32 %v773_v28, %v481_v2 }
 0x2b9   :  { %v483_v29 = vpop.f32.mrf.mxu3 }
 0x2ba   :  { %v484_v31 = vadd.f32 %v773_v28, %v483_v29 }
 0x2bc   :  { %v488_v34 = vpack.c.bf16 %v484_v31, %v482_v30 }
 0x2be   :  { %504 = vmatpush.bf16.msrb.mxu0 %v488_v34 }
 0x2c1   :  { %700 = vmatmul.msk.bf16.vlgmr.msrb.gmra.mxu0 %vm149_vm0, %v699_v35 }
 0x33e   :  { %v506_v39 = vpop.f32.mrf.mxu0 }
 0x346   :  { %v508_v40 = vpop.f32.mrf.mxu0 }
 0x347   :  { %v527_v41 = vpack.c.bf16 %v508_v40, %v506_v39 }
 0x349   :  { %588 = vmatmul.bf16.vlgmr.msrb.gmra.mxu2 %v527_v41 }
 0x3cc   :  { %v589_v43 = vpop.f32.mrf.mxu2 }
 0x3cd   :  { %v590_v44 = vadd.f32 %v774_v42, %v589_v43 }
 0x3cf   :  { %v594_v45 = vpack.c.bf16 %v590_v44, %v590_v44 }
 0x3d1   :  { %596 = vst [vmem:[#allocation13] sm:$0xf] %v594_v45 }
 0x3d4   :  { %v591_v46 = vpop.f32.mrf.mxu2 }
 0x3d5   :  { %v592_v47 = vadd.f32 %v774_v42, %v591_v46 }
 0x3d7   :  { %v595_v48 = vpack.c.bf16 %v592_v47, %v592_v47 }
 0x3d9   :  { %597 = vst [vmem:[#allocation13 + $0x4] sm:$0x1] %v595_v48 }
 0x3da   :  { %610 = dma.vmem_to_hbm [thread:$0]  %s603_s12, 128, %s605_s15, [#allocation4], %s962_s25, %s962_s25, %s963_s26  }
 0x3db   :  { %959 = dma.done.wait [#allocation4], 128  }
 0x3dc   :  { %960 = vsyncadd [#allocation4], 4294967168 }
 0x3dd   :  { %615 = vsyncpa [#allocation3], 1 }
 0x3de   :  { %616 = vsyncpa [#allocation6], 1 }
 0x3df   :  { %617 = vsyncpa [#allocation9], 1 }
 0x3e0   :  { %618 = vsyncpa [#allocation12], 1 }
 0x3e1   :  { %619 = vsyncpa [#allocation4], 1 }

</bundles_post_ra>
